<compile_context>
chip_gen: v7x
topology: tpu7x:2x2x1
jax: 0.10.0
libtpu: 0.0.40
codegen_flags: <defaults>
</compile_context>

<pallas_src>
import functools
import math

import jax
import jax.numpy as jnp
from jax.experimental import pallas as pl
from jax.experimental.pallas import tpu as pltpu


def _round_up(x, m):
    return (x + m - 1) // m * m


def _wbce_kernel(wm1_ref, logits_ref, targets_ref, out_ref, *,
                 tb, tiles_per_shard, valid_rows, needs_mask):
    s = pl.program_id(0)   # shard (parallel axis)
    i = pl.program_id(1)   # batch tile within shard (reduction axis)

    @pl.when(i == 0)
    def _():
        out_ref[...] = jnp.zeros_like(out_ref)

    x = logits_ref[...].astype(jnp.float32)    # (tb, Ck)
    y = targets_ref[...].astype(jnp.float32)   # (tb, Ck)
    wm1 = wm1_ref[...]                         # (1, Ck) = pos_weight - 1 (f32)

    nx = -x
    # numerically stable softplus(-x) = log1p(exp(-|x|)) + max(-x, 0),
    # with -|x| = min(x, -x) to reuse the single negate.
    softplus_neg = jnp.log1p(jnp.exp(jnp.minimum(x, nx))) + jnp.maximum(nx, 0.0)
    loss = (1.0 - y) * x + (1.0 + wm1 * y) * softplus_neg   # (tb, Ck)

    c = loss.shape[-1]

    def fold(v):
        # (tb, Ck) -> (8, Ck): pure VPU vreg adds, no cross-lane/sublane reduce.
        return jnp.sum(v.reshape(tb // 8, 8, c), axis=0)

    if needs_mask:  # static python bool
        g = s * tiles_per_shard + i          # global batch-tile index
        last_full = valid_rows // tb         # number of fully-valid tiles

        @pl.when(g < last_full)              # fast path: no mask emitted at runtime
        def _():
            out_ref[...] += fold(loss)

        @pl.when(g >= last_full)             # ragged / over-covered tiles only
        def _():
            rows = g * tb + jax.lax.broadcasted_iota(jnp.int32, loss.shape, 0)
            out_ref[...] += fold(jnp.where(rows < valid_rows, loss, 0.0))
    else:
        out_ref[...] += fold(loss)


def weighted_bce_with_logits_loss(logits, targets, pos_weight, *,
                                  target_block_bytes=2 * 1024 * 1024,
                                  num_shards=1,
                                  vmem_limit_bytes=None):
    """logits, targets: (B, C) f32/bf16; pos_weight: (C,). Returns scalar f32 mean loss."""
    B, C = logits.shape
    assert targets.shape == (B, C)
    pos_weight = jnp.asarray(pos_weight, dtype=jnp.float32).reshape(1, C)

    # ---- lane-dense layout: fold k rows into one so the lane dim is a
    #      multiple of 128. Pure reshape (no data movement / no extra compute).
    k = 1
    if C % 128 != 0:
        k_try = 128 // math.gcd(C, 128)
        if k_try > 1 and B % k_try == 0:
            k = k_try
    Bk, Ck = B // k, k * C
    logits2 = logits.reshape(Bk, Ck)
    targets2 = targets.reshape(Bk, Ck)
    wm1 = pos_weight - 1.0
    if k > 1:
        wm1 = jnp.tile(wm1, (1, k))          # (1, k*C)

    itemsize = max(jnp.dtype(logits.dtype).itemsize,
                   jnp.dtype(targets.dtype).itemsize)

    # ---- batch tile sized by bytes (~target_block_bytes per input block),
    #      multiple of 8 rows, never taller than the (8-rounded) row count.
    tb = max(8, (target_block_bytes // (Ck * itemsize)) // 8 * 8)
    tb = min(tb, _round_up(Bk, 8))

    # VMEM footprint: 2 double-buffered input blocks + ~4 f32 (tb,Ck)
    # temporaries + small resident blocks. Keep comfortably under v7x's 64 MiB.
    def _vmem_est(rows):
        return (2 * 2 * rows * Ck * itemsize
                + 4 * rows * Ck * 4
                + 4 * 8 * Ck * 4)
    while tb > 8 and _vmem_est(tb) > 32 * 1024 * 1024:
        tb = max(8, (tb // 2) // 8 * 8)
    if vmem_limit_bytes is None:
        vmem_limit_bytes = int(min(max(_vmem_est(tb) * 3 // 2, 4 * 1024 * 1024),
                                   48 * 1024 * 1024))

    # ---- pad ONLY the "array shorter than one tile" corner (a few KiB);
    #      large ragged B is handled by the in-kernel row mask with no copy.
    rows_arr = Bk
    if tb > Bk:
        pad = ((0, tb - Bk), (0, 0))
        logits2 = jnp.pad(logits2, pad)
        targets2 = jnp.pad(targets2, pad)
        rows_arr = tb

    tiles_total = pl.cdiv(rows_arr, tb)
    n_shards = max(1, min(num_shards, tiles_total))
    tiles_per_shard = pl.cdiv(tiles_total, n_shards)
    n_shards = pl.cdiv(tiles_total, tiles_per_shard)     # drop empty shards
    covered_rows = n_shards * tiles_per_shard * tb
    needs_mask = covered_rows > Bk
    last_block = tiles_total - 1                         # clamp target for extra tiles

    kernel = functools.partial(
        _wbce_kernel, tb=tb, tiles_per_shard=tiles_per_shard,
        valid_rows=Bk, needs_mask=needs_mask)

    def _in_map(s, i):
        # Clamp so over-covering tiles re-read the last valid block (their
        # contribution is fully masked in-kernel) instead of DMA-ing past HBM.
        return (jnp.minimum(s * tiles_per_shard + i, last_block), 0)

    partials = pl.pallas_call(
        kernel,
        out_shape=jax.ShapeDtypeStruct((n_shards * 8, Ck), jnp.float32),
        grid_spec=pltpu.PrefetchScalarGridSpec(
            num_scalar_prefetch=0,
            grid=(n_shards, tiles_per_shard),
            in_specs=[
                pl.BlockSpec((1, Ck), lambda s, i: (0, 0)),   # pos_weight-1 (resident)
                pl.BlockSpec((tb, Ck), _in_map),
                pl.BlockSpec((tb, Ck), _in_map),
            ],
            out_specs=pl.BlockSpec((8, Ck), lambda s, i: (s, 0)),   # resident accumulator
        ),
        compiler_params=pltpu.CompilerParams(
            dimension_semantics=("parallel", "arbitrary"),
            vmem_limit_bytes=vmem_limit_bytes,
        ),
    )(wm1, logits2, targets2)

    # Single tiny cross-lane reduction outside the hot loop.
    return jnp.sum(partials) * (1.0 / float(B * C))


def _reference(logits, targets, pos_weight):
    x = logits.astype(jnp.float32)
    y = targets.astype(jnp.float32)
    p = jnp.asarray(pos_weight, jnp.float32).reshape(1, -1)
    log_weight = 1.0 + (p - 1.0) * y
    softplus_neg = jnp.log1p(jnp.exp(-jnp.abs(x))) + jnp.maximum(-x, 0.0)
    return jnp.mean((1.0 - y) * x + log_weight * softplus_neg)


if __name__ == "__main__":
    key = jax.random.PRNGKey(0)

    def run_case(B, C, dtype, **kw):
        k1, k2, k3 = jax.random.split(jax.random.fold_in(key, B * 131 + C), 3)
        logits = (jax.random.normal(k1, (B, C), dtype=jnp.float32) * 2.0).astype(dtype)
        # soft targets in [0, 1] (binary_cross_entropy_with_logits allows this)
        targets = jax.random.uniform(k2, (B, C), dtype=jnp.float32).astype(dtype)
        pos_weight = jax.random.uniform(k3, (C,), dtype=jnp.float32,
                                        minval=0.5, maxval=3.0)
        out = jax.block_until_ready(
            weighted_bce_with_logits_loss(logits, targets, pos_weight, **kw))
        ref = _reference(logits, targets, pos_weight)
        assert jnp.allclose(out, ref, rtol=1e-5, atol=1e-5), (B, C, dtype, out, ref)

    run_case(16, 8, jnp.float32)                          # small C -> lane-dense reshape
    run_case(37, 128, jnp.float32)                        # ragged B, single-tile corner
    run_case(64, 128, jnp.bfloat16)                       # bf16 pass-through, mask-free path
    run_case(40, 128, jnp.float32,                        # multi-tile, 2 shards, ragged tail
             target_block_bytes=4096, num_shards=2)

    print("KERNEL_OK")
</pallas_src>

<mosaic_0001>
module attributes {stable_mosaic.version = 11 : i64} {
  func.func @_wbce_kernel(%arg0: i32, %arg1: i32, %arg2: memref<1x128xf32, #tpu.memory_space<vmem>>, %arg3: memref<8x128xf32, #tpu.memory_space<vmem>>, %arg4: memref<8x128xf32, #tpu.memory_space<vmem>>, %arg5: memref<8x128xf32, #tpu.memory_space<vmem>>) attributes {dimension_semantics = [#tpu.dimension_semantics<parallel>, #tpu.dimension_semantics<arbitrary>], iteration_bounds = array<i64: 1, 1>, scalar_prefetch = 0 : i64, scratch_operands = 0 : i64, tpu.core_type = #tpu.core_type<tc>, window_params = [{pipeline_mode = #tpu.pipeline_mode<synchronous>, transform_indices = @transform_0, window_bounds = array<i64: 1, 128>}, {transform_indices = @transform_1, window_bounds = array<i64: 8, 128>}, {transform_indices = @transform_2, window_bounds = array<i64: 8, 128>}, {transform_indices = @transform_3, window_bounds = array<i64: 8, 128>}]} {
    %c0_i32 = arith.constant 0 : i32
    %0 = arith.cmpi eq, %arg1, %c0_i32 : i32
    %1 = arith.extui %0 : i1 to i32
    %c0_i32_0 = arith.constant 0 : i32
    %2 = arith.cmpi ne, %1, %c0_i32_0 : i32
    scf.if %2 {
      %cst_13 = arith.constant 0.000000e+00 : f32
      %31 = vector.broadcast %cst_13 : f32 to vector<8x128xf32>
      %c0_14 = arith.constant 0 : index
      %c0_15 = arith.constant 0 : index
      %32 = vector.load %arg5[%c0_14, %c0_15] : memref<8x128xf32, #tpu.memory_space<vmem>>, vector<8x128xf32>
      tpu.vector_store %arg5[%c0_14, %c0_15], %31 {strides = array<i32>} : memref<8x128xf32, #tpu.memory_space<vmem>>, vector<8x128xf32>,
    } else {
    }
    %c0 = arith.constant 0 : index
    %c0_1 = arith.constant 0 : index
    %3 = vector.load %arg3[%c0, %c0_1] : memref<8x128xf32, #tpu.memory_space<vmem>>, vector<8x128xf32>
    %c0_2 = arith.constant 0 : index
    %c0_3 = arith.constant 0 : index
    %4 = vector.load %arg4[%c0_2, %c0_3] : memref<8x128xf32, #tpu.memory_space<vmem>>, vector<8x128xf32>
    %c0_4 = arith.constant 0 : index
    %c0_5 = arith.constant 0 : index
    %5 = vector.load %arg2[%c0_4, %c0_5] : memref<1x128xf32, #tpu.memory_space<vmem>>, vector<1x128xf32>
    %cst = arith.constant 0.000000e+00 : f32
    %6 = vector.broadcast %cst : f32 to vector<8x128xf32>
    %7 = arith.subf %6, %3 : vector<8x128xf32>
    %8 = arith.minimumf %3, %7 : vector<8x128xf32>
    %9 = math.exp %8 : vector<8x128xf32>
    %10 = math.log1p %9 : vector<8x128xf32>
    %cst_6 = arith.constant 0.000000e+00 : f32
    %11 = vector.broadcast %cst_6 : f32 to vector<8x128xf32>
    %12 = arith.maximumf %7, %11 : vector<8x128xf32>
    %13 = arith.addf %10, %12 : vector<8x128xf32>
    %cst_7 = arith.constant 1.000000e+00 : f32
    %14 = vector.broadcast %cst_7 : f32 to vector<8x128xf32>
    %15 = arith.subf %14, %4 : vector<8x128xf32>
    %16 = arith.mulf %15, %3 : vector<8x128xf32>
    %17 = vector.broadcast %5 : vector<1x128xf32> to vector<8x128xf32>
    %18 = arith.mulf %17, %4 : vector<8x128xf32>
    %cst_8 = arith.constant 1.000000e+00 : f32
    %19 = vector.broadcast %cst_8 : f32 to vector<8x128xf32>
    %20 = arith.addf %19, %18 : vector<8x128xf32>
    %21 = arith.mulf %20, %13 : vector<8x128xf32>
    %22 = arith.addf %16, %21 : vector<8x128xf32>
    %c1_i32 = arith.constant 1 : i32
    %23 = arith.muli %arg0, %c1_i32 : i32
    %24 = arith.addi %23, %arg1 : i32
    %c0_i32_9 = arith.constant 0 : i32
    %25 = arith.cmpi slt, %24, %c0_i32_9 : i32
    %26 = arith.extui %25 : i1 to i32
    %c0_i32_10 = arith.constant 0 : i32
    %27 = arith.cmpi ne, %26, %c0_i32_10 : i32
    scf.if %27 {
      %c0_13 = arith.constant 0 : index
      %c0_14 = arith.constant 0 : index
      %31 = vector.load %arg5[%c0_13, %c0_14] : memref<8x128xf32, #tpu.memory_space<vmem>>, vector<8x128xf32>
      %32 = vector.shape_cast %22 : vector<8x128xf32> to vector<1x8x128xf32>
      %cst_15 = arith.constant dense<0.000000e+00> : vector<8x128xf32>
      %33 = vector.multi_reduction <add>, %32, %cst_15 [0] : vector<1x8x128xf32> to vector<8x128xf32>
      %34 = arith.addf %31, %33 : vector<8x128xf32>
      %c0_16 = arith.constant 0 : index
      %c0_17 = arith.constant 0 : index
      %35 = vector.load %arg5[%c0_16, %c0_17] : memref<8x128xf32, #tpu.memory_space<vmem>>, vector<8x128xf32>
      tpu.vector_store %arg5[%c0_16, %c0_17], %34 {strides = array<i32>} : memref<8x128xf32, #tpu.memory_space<vmem>>, vector<8x128xf32>,
    } else {
    }
    %c0_i32_11 = arith.constant 0 : i32
    %28 = arith.cmpi sge, %24, %c0_i32_11 : i32
    %29 = arith.extui %28 : i1 to i32
    %c0_i32_12 = arith.constant 0 : i32
    %30 = arith.cmpi ne, %29, %c0_i32_12 : i32
    scf.if %30 {
      %c8_i32 = arith.constant 8 : i32
      %31 = arith.muli %24, %c8_i32 : i32
      %32 = tpu.iota {dimensions = array<i32: 0>} : vector<8x128xi32>
      %33 = vector.broadcast %31 : i32 to vector<8x128xi32>
      %34 = arith.addi %33, %32 : vector<8x128xi32>
      %c0_13 = arith.constant 0 : index
      %c0_14 = arith.constant 0 : index
      %35 = vector.load %arg5[%c0_13, %c0_14] : memref<8x128xf32, #tpu.memory_space<vmem>>, vector<8x128xf32>
      %c1_i32_15 = arith.constant 1 : i32
      %36 = vector.broadcast %c1_i32_15 : i32 to vector<8x128xi32>
      %37 = arith.cmpi slt, %34, %36 : vector<8x128xi32>
      %cst_16 = arith.constant 0.000000e+00 : f32
      %38 = vector.broadcast %cst_16 : f32 to vector<8x128xf32>
      %39 = arith.select %37, %22, %38 : vector<8x128xi1>, vector<8x128xf32>
      %40 = vector.shape_cast %39 : vector<8x128xf32> to vector<1x8x128xf32>
      %cst_17 = arith.constant dense<0.000000e+00> : vector<8x128xf32>
      %41 = vector.multi_reduction <add>, %40, %cst_17 [0] : vector<1x8x128xf32> to vector<8x128xf32>
      %42 = arith.addf %35, %41 : vector<8x128xf32>
      %c0_18 = arith.constant 0 : index
      %c0_19 = arith.constant 0 : index
      %43 = vector.load %arg5[%c0_18, %c0_19] : memref<8x128xf32, #tpu.memory_space<vmem>>, vector<8x128xf32>
      tpu.vector_store %arg5[%c0_18, %c0_19], %42 {strides = array<i32>} : memref<8x128xf32, #tpu.memory_space<vmem>>, vector<8x128xf32>,
    } else {
    }
    return
  }
  func.func @transform_0(%arg0: i32, %arg1: i32) -> (i32, i32) {
    %c0_i32 = arith.constant 0 : i32
    %c0_i32_0 = arith.constant 0 : i32
    %c0_i32_1 = arith.constant 0 : i32
    return %c0_i32, %c0_i32_0 : i32, i32
  }
  func.func @transform_1(%arg0: i32, %arg1: i32) -> (i32, i32) {
    %c1_i32 = arith.constant 1 : i32
    %0 = arith.muli %arg0, %c1_i32 : i32
    %1 = arith.addi %0, %arg1 : i32
    %c0_i32 = arith.constant 0 : i32
    %2 = arith.minsi %1, %c0_i32 : i32
    %c0_i32_0 = arith.constant 0 : i32
    %c0_i32_1 = arith.constant 0 : i32
    return %2, %c0_i32_0 : i32, i32
  }
  func.func @transform_2(%arg0: i32, %arg1: i32) -> (i32, i32) {
    %c1_i32 = arith.constant 1 : i32
    %0 = arith.muli %arg0, %c1_i32 : i32
    %1 = arith.addi %0, %arg1 : i32
    %c0_i32 = arith.constant 0 : i32
    %2 = arith.minsi %1, %c0_i32 : i32
    %c0_i32_0 = arith.constant 0 : i32
    %c0_i32_1 = arith.constant 0 : i32
    return %2, %c0_i32_0 : i32, i32
  }
  func.func @transform_3(%arg0: i32, %arg1: i32) -> (i32, i32) {
    %c0_i32 = arith.constant 0 : i32
    %c0_i32_0 = arith.constant 0 : i32
    return %arg0, %c0_i32 : i32, i32
  }
}

</mosaic_0001>

<bundles_post_ra>
// kernel: tpu_custom_call.1
= control target key start
LH: loop header
LB: loop body
LE: loop exit
PB: predicated region body
PF: predicated region fallthrough
CT: control target
= control target key end

     0   :  { %8 = vsyncpa [#allocation3], 0  ;;  %s321_s0 = inlined_call_operand.hbm [shape: f32[1,128], index: 0, kind: input, shape index: {}]   ;;  %s322_s1 = inlined_call_operand.hbm [shape: f32[8,128], index: 1, kind: input, shape index: {}]   ;;  %s323_s2 = inlined_call_operand.hbm [shape: f32[8,128], index: 2, kind: input, shape index: {}]   ;;  %s324_s3 = inlined_call_operand.hbm [shape: f32[8,128], index: 3, kind: output, shape index: {}]  }
   0x1   :  { %9 = vsyncpa [#allocation6], 0 }
   0x2   :  { %10 = vsyncpa [#allocation4], 0  ;;  %s249_s12 = smov [#allocation5]   ;;  %s250_s14 = smov [#allocation2]  }
   0x3   :  { %s32_s13 = sshll.u32 %s249_s12, 4  ;;  %s17_s15 = sshll.u32 %s250_s14, 4  ;;  %s33_s13 = int_to_ptr.vmem [resolvable:$true] %s32_s13  ;;  %s18_s15 = int_to_ptr.vmem [resolvable:$true] %s17_s15 }
   0x4   :  { %s155_s18 = scalar_lea.hbm %s322_s1, 128 }
   0x5   :  { %p156_p0 = scmp.ne.s32.totalorder %s322_s1, %s155_s18  ;;  %p159_p1 = scmp.lt.u32.totalorder %s155_s18, %s322_s1 }
   0x7   :  { %p161_p2 = pnand %p159_p1, %p156_p0 }
   0x9   :  { %164 = shalt.err (!%p161_p2)
}
   0xa   :  { %s165_s23 = scalar_lea.vmem %s33_s13, 128  ;;  %p170_p4 = scmp.lt.s32.totalorder %s33_s13, %s33_s13 }
   0xb   :  { %p166_p3 = scmp.ne.s32.totalorder %s33_s13, %s165_s23  ;;  %p171_p5 = scmp.lt.s32.totalorder %s165_s23, %s165_s23 }
   0xd   :  { %p172_p6 = por %p171_p5, %p170_p4 }
   0xf   :  { %p173_p7 = pnand %p172_p6, %p166_p3 }
  0x11   :  { %176 = shalt.err (!%p173_p7)
}
  0x12   :  { %35 = dma.hbm_to_vmem [thread:$0]  %s322_s1, 128, %s33_s13, [#allocation6]  }
  0x13   :  { %s177_s28 = scalar_lea.hbm %s321_s0, 16 }
  0x14   :  { %p178_p8 = scmp.ne.s32.totalorder %s321_s0, %s177_s28  ;;  %p181_p9 = scmp.lt.u32.totalorder %s177_s28, %s321_s0 }
  0x16   :  { %p183_p10 = pnand %p181_p9, %p178_p8 }
  0x18   :  { %186 = shalt.err (!%p183_p10)
}
  0x19   :  { %s187_s6 = scalar_lea.vmem %s18_s15, 16  ;;  %s191_s7 = scalar_lea.vmem %s18_s15, 32 }
  0x1a   :  { %p188_p11 = scmp.ne.s32.totalorder %s18_s15, %s187_s6  ;;  %p192_p12 = scmp.lt.s32.totalorder %s18_s15, %s18_s15 }
  0x1b   :  { %p193_p13 = scmp.lt.s32.totalorder %s191_s7, %s187_s6 }
  0x1d   :  { %p194_p0 = por %p193_p13, %p192_p12 }
  0x1f   :  { %p195_p1 = pnand %p194_p0, %p188_p11 }
  0x21   :  { %198 = shalt.err (!%p195_p1)
}
  0x22   :  { %20 = dma.hbm_to_vmem [thread:$0]  %s321_s0, 16, %s18_s15, [#allocation3]  }
  0x23   :  { %s251_s9 = smov [#allocation7]   ;;  %s199_s13 = scalar_lea.hbm %s323_s2, 128 }
  0x24   :  { %s47_s10 = sshll.u32 %s251_s9, 4  ;;  %p200_p2 = scmp.ne.s32.totalorder %s323_s2, %s199_s13  ;;  %s48_s10 = int_to_ptr.vmem [resolvable:$true] %s47_s10 }
  0x25   :  { %p203_p3 = scmp.lt.u32.totalorder %s199_s13, %s323_s2 }
  0x27   :  { %p205_p4 = pnand %p203_p3, %p200_p2 }
  0x29   :  { %208 = shalt.err (!%p205_p4)
}
  0x2a   :  { %s209_s19 = scalar_lea.vmem %s48_s10, 128  ;;  %p214_p6 = scmp.lt.s32.totalorder %s48_s10, %s48_s10 }
  0x2b   :  { %p210_p5 = scmp.ne.s32.totalorder %s48_s10, %s209_s19  ;;  %p215_p7 = scmp.lt.s32.totalorder %s209_s19, %s209_s19 }
  0x2d   :  { %p216_p8 = por %p215_p7, %p214_p6 }
  0x2f   :  { %p217_p9 = pnand %p216_p8, %p210_p5 }
  0x31   :  { %220 = shalt.err (!%p217_p9)
}
  0x32   :  { %50 = dma.hbm_to_vmem [thread:$0]  %s323_s2, 128, %s48_s10, [#allocation6]  }
  0x33   :  { %243 = dma.done.wait [#allocation3], 16  }
  0x34   :  { %244 = vsyncadd [#allocation3], 4294967280 }
  0x35   :  { %245 = dma.done.wait [#allocation6], 256  }
  0x36   :  { %246 = vsyncadd [#allocation6], 4294967040  ;;  %v71_v0 = vld [vmem:[#allocation5] sm:$0xff]  ;;  %v72_v7 = vld [vmem:[#allocation7] sm:$0xff]  ;;  %v115_v13 = vlaneseq  ;;  %s252_s2 = smov [#allocation8]  }
  0x37   :  { %v74_v1 = vsub.f32 0.0, %v71_v0  ;;  %v145_v8 = vld [vmem:[#allocation2] ss:$0 sm:$0xff]  ;;  %v89_v16 = vsub.f32 1.0, %v72_v7  ;;  %s131_s20 = sshll.u32 %s252_s2, 4  ;;  %s132_s20 = int_to_ptr.vmem [resolvable:$true] %s131_s20 }
  0x38   :  { %v97_v11 = vmul.f32 %v145_v8, %v72_v7  ;;  %v116_v20 = vshrl.u32 %v115_v13, 7  ;;  %s221_s21 = scalar_lea.vmem %s132_s20, 128  ;;  %p226_p11 = scmp.lt.s32.totalorder %s132_s20, %s132_s20 }
  0x39   :  { %v75_v2 = vmin.f32 %v71_v0, %v74_v1  ;;  %v87_v15 = vmax.f32 %v74_v1, 0.0  ;;  %v90_v22 = vmul.f32 %v89_v16, %v71_v0  ;;  %p222_p10 = scmp.ne.s32.totalorder %s132_s20, %s221_s21  ;;  %p227_p12 = scmp.lt.s32.totalorder %s221_s21, %s221_s21 }
  0x3a   :  { %v98_v18 = vadd.f32 1.0, %v97_v11  ;;  %vm120_vm1 = vcmp.lt.s32.totalorder %v116_v20, 1 }
  0x3b   :  { %v76_v3 = vmul.f32 1.442695, %v75_v2  ;;  %p228_p13 = por %p227_p12, %p226_p11 }
  0x3d   :  { %151 = vpow2.f32 %v76_v3  ;;  %p229_p0 = pnand %p228_p13, %p222_p10 }
  0x47   :  { %v152_v4 = vpop.eup %151 }
  0x48   :  { %v78_v5 = vadd.f32 1.0, %v152_v4  ;;  %v81_v6 = vmul.f32 -0.5, %v152_v4  ;;  %v84_v10 = vand.u32 2147483647, %v152_v4 }
  0x4a   :  { %153 = vlog2.f32 %v78_v5  ;;  %v82_v9 = vadd.f32 1.0, %v81_v6  ;;  %vm85_vm0 = vcmp.lt.f32.partialorder %v84_v10, 0.0004427343 }
  0x4c   :  { %v83_v12 = vmul.f32 %v152_v4, %v82_v9 }
  0x54   :  { %v154_v14 = vpop.eup %153 }
  0x55   :  { %v80_v17 = vmul.f32 0.6931472, %v154_v14 }
  0x57   :  { %v86_v19 = vsel %vm85_vm0, %v83_v12, %v80_v17 }
  0x58   :  { %v88_v21 = vadd.f32 %v87_v15, %v86_v19 }
  0x5a   :  { %v99_v23 = vmul.f32 %v98_v18, %v88_v21 }
  0x5c   :  { %v100_v24 = vadd.f32 %v99_v23, %v90_v22 }
  0x5e   :  { %v121_v25 = vsel %vm120_vm1, %v100_v24, 0.0 }
  0x5f   :  { %124 = vst [vmem:[#allocation8] sm:$0xff] %v121_v25 }
  0x60   :  { %232 = shalt.err (!%p229_p0)
}
  0x61   :  { %s233_s24 = scalar_lea.hbm %s324_s3, 128 }
  0x62   :  { %p234_p1 = scmp.ne.s32.totalorder %s324_s3, %s233_s24  ;;  %p237_p2 = scmp.lt.u32.totalorder %s233_s24, %s324_s3 }
  0x64   :  { %p239_p3 = pnand %p237_p2, %p234_p1 }
  0x66   :  { %242 = shalt.err (!%p239_p3)
}
  0x67   :  { %134 = dma.vmem_to_hbm [thread:$0]  %s132_s20, 128, %s324_s3, [#allocation4]  }
  0x68   :  { %247 = dma.done.wait [#allocation4], 128  }
  0x69   :  { %248 = vsyncadd [#allocation4], 4294967168 }
  0x6a   :  { %138 = vsyncpa [#allocation3], 1 }
  0x6b   :  { %139 = vsyncpa [#allocation6], 1 }
  0x6c   :  { %140 = vsyncpa [#allocation4], 1 }

</bundles_post_ra>
